<compile_context>
chip_gen: v7x
topology: tpu7x:2x2x1
jax: 0.10.0
libtpu: 0.0.40
codegen_flags: <defaults>
</compile_context>

<pallas_src>
import jax
import jax.numpy as jnp
from jax.experimental import pallas as pl
from jax.experimental.pallas import tpu as pltpu

MAX_SEQ_LEN = 16   # module __init__ arg (table capacity)
EMB_DIM = 32       # module __init__ arg

_SUBLANE = 8
_LANE = 128


def sinusoid_encoding_table(max_seq_len, emb_dim):
    """Faithful port of PositionEmbedding.sinusoid_encoding_table (minus the
    leading unsqueeze).  NOTE: the reference's `.div(...)` is not in-place, so
    the frequency scaling is intentionally dropped here too."""
    pos = jnp.broadcast_to(
        jnp.arange(max_seq_len, dtype=jnp.float32)[:, None], (max_seq_len, emb_dim)
    )
    dim = jnp.arange(emb_dim)[None, :]
    return jnp.where(dim % 2 == 0, jnp.sin(pos), jnp.cos(pos))  # (max_seq_len, emb_dim) f32


def pos_emb_kernel(x_ref, pe_ref, o_ref):
    # x_ref: (b_tile, lane_tile) input tile; pe_ref: (1, lane_tile) resident f32 row.
    # Add in f32 (matches torch promotion); pe broadcasts over the batch sublanes.
    o_ref[...] = (x_ref[...].astype(jnp.float32) + pe_ref[...]).astype(o_ref.dtype)


def _choose_tiles(B, SD, in_itemsize, out_itemsize, target_bytes=8 << 20):
    """Pick (b_tile, lane_tile) so the TOTAL per-step VMEM footprint
    (double-buffered input + double-buffered f32 output + pe row) stays near
    `target_bytes`.  Forces >=2 grid steps for non-trivial problems (v7x has
    2 TensorCores).  Returns (b_tile, lane_tile, footprint_bytes)."""
    per_elem = 2 * (in_itemsize + out_itemsize)   # x tile + out tile, double-buffered
    pe_per_lane = 2 * 4                           # (1, lane_tile) f32 table, x2 buffers

    def footprint(b_t, l_t):
        return b_t * l_t * per_elem + l_t * pe_per_lane

    # Lane tile: keep the full row if an 8-row block fits the budget; otherwise
    # split the lane axis into multiple-of-128 chunks (unmasked stores, bounded VMEM).
    lane_tile = SD
    if footprint(min(B, _SUBLANE), SD) > target_bytes:
        lanes_cap = target_bytes // (_SUBLANE * per_elem + pe_per_lane)
        lane_tile = min(SD, max(_LANE, (lanes_cap // _LANE) * _LANE))

    # Batch tile: full batch or the largest multiple of 8 that fits the budget.
    cap = (target_bytes - lane_tile * pe_per_lane) // (lane_tile * per_elem)
    if cap >= B:
        b_tile = B
    else:
        b_tile = min(B, max(_SUBLANE, (cap // _SUBLANE) * _SUBLANE))

    # Megacore: if the whole (non-trivial) problem fits in one block, split so
    # the grid has >=2 steps and "parallel" can shard across v7x's two TCs.
    if b_tile >= B and lane_tile >= SD and footprint(B, SD) > (256 << 10):
        if B >= 2 * _SUBLANE:
            b_tile = max(_SUBLANE, ((B // 2) // _SUBLANE) * _SUBLANE)
        elif SD >= 2 * _LANE:
            lane_tile = max(_LANE, (pl.cdiv(SD, 2) // _LANE) * _LANE)

    return b_tile, lane_tile, footprint(b_tile, lane_tile)


def position_embedding(batch_seq, emb_table):
    B, S, D = batch_seq.shape
    max_seq_len, emb_dim = emb_table.shape
    assert max_seq_len >= S, (
        f"Lenght of the sequence ({S}) should be either equal or smaller than "
        f"max_seq_len ({max_seq_len})"
    )
    assert emb_dim >= D

    SD = S * D
    out_dtype = jnp.promote_types(batch_seq.dtype, emb_table.dtype)  # f32, like torch

    # Lane-dense 2D slabs: (B, SD_pad) and (1, SD_pad); pad SD to a multiple of
    # 128 so every output store is an unmasked, lane-dense vst.
    SD_pad = pl.cdiv(SD, _LANE) * _LANE
    x2 = batch_seq.reshape(B, SD)
    pe = emb_table[:S, :D].reshape(1, SD).astype(jnp.float32)
    if SD_pad != SD:
        x2 = jnp.pad(x2, ((0, 0), (0, SD_pad - SD)))
        pe = jnp.pad(pe, ((0, 0), (0, SD_pad - SD)))

    in_bytes = jnp.dtype(batch_seq.dtype).itemsize
    out_bytes = jnp.dtype(out_dtype).itemsize
    b_tile, lane_tile, fp_bytes = _choose_tiles(B, SD_pad, in_bytes, out_bytes)
    grid = (pl.cdiv(B, b_tile), pl.cdiv(SD_pad, lane_tile))

    # Scoped-VMEM headroom covering the real footprint (+slack); stays well
    # below v7x's 64 MiB physical VMEM and safe on v5e's 16 MiB default scope.
    vmem_limit = int(min(48 << 20, max(fp_bytes + (4 << 20), 16 << 20)))

    # Donate the f32 input slab into the output when dtypes already match.
    io_aliases = {0: 0} if x2.dtype == out_dtype else {}

    out2 = pl.pallas_call(
        pos_emb_kernel,
        out_shape=jax.ShapeDtypeStruct((B, SD_pad), out_dtype),
        grid=grid,
        in_specs=[
            pl.BlockSpec((b_tile, lane_tile), lambda i, j: (i, j)),   # x tile
            pl.BlockSpec((1, lane_tile), lambda i, j: (0, j)),        # pe, batch-resident
        ],
        out_specs=pl.BlockSpec((b_tile, lane_tile), lambda i, j: (i, j)),
        compiler_params=pltpu.CompilerParams(
            dimension_semantics=("parallel", "parallel"),
            vmem_limit_bytes=vmem_limit,
        ),
        input_output_aliases=io_aliases,
    )(x2, pe)

    return out2[:, :SD].reshape(B, S, D)


def _reference(batch_seq, emb_table):
    # Pure-JAX reference matching the (buggy-but-faithful) PyTorch semantics.
    _, S, D = batch_seq.shape
    return batch_seq.astype(jnp.float32) + emb_table[None, :S, :D]


if __name__ == "__main__":
    key = jax.random.PRNGKey(0)
    # batch=2, seq=8 (<= MAX_SEQ_LEN), emb=32
    x = jax.random.normal(key, (2, 8, EMB_DIM), dtype=jnp.float32)
    table = sinusoid_encoding_table(MAX_SEQ_LEN, EMB_DIM)

    out = jax.block_until_ready(position_embedding(x, table))

    ref = _reference(x, table)
    assert out.shape == x.shape
    assert out.dtype == ref.dtype
    assert jnp.allclose(out, ref, atol=1e-5, rtol=1e-5)

    print("KERNEL_OK")
</pallas_src>

<mosaic_0001>
module attributes {stable_mosaic.version = 11 : i64} {
  func.func @pos_emb_kernel(%arg0: i32, %arg1: i32, %arg2: memref<2x256xf32, #tpu.memory_space<vmem>>, %arg3: memref<1x256xf32, #tpu.memory_space<vmem>>, %arg4: memref<2x256xf32, #tpu.memory_space<vmem>>) attributes {dimension_semantics = [#tpu.dimension_semantics<parallel>, #tpu.dimension_semantics<parallel>], iteration_bounds = array<i64: 1, 1>, scalar_prefetch = 0 : i64, scratch_operands = 0 : i64, tpu.core_type = #tpu.core_type<tc>, window_params = [{transform_indices = @transform_0, window_bounds = array<i64: 2, 256>}, {transform_indices = @transform_1, window_bounds = array<i64: 1, 256>}, {transform_indices = @transform_2, window_bounds = array<i64: 2, 256>}]} {
    %c0 = arith.constant 0 : index
    %c0_0 = arith.constant 0 : index
    %0 = vector.load %arg2[%c0, %c0_0] : memref<2x256xf32, #tpu.memory_space<vmem>>, vector<2x256xf32>
    %c0_1 = arith.constant 0 : index
    %c0_2 = arith.constant 0 : index
    %1 = vector.load %arg3[%c0_1, %c0_2] : memref<1x256xf32, #tpu.memory_space<vmem>>, vector<1x256xf32>
    %2 = vector.broadcast %1 : vector<1x256xf32> to vector<2x256xf32>
    %3 = arith.addf %0, %2 : vector<2x256xf32>
    %c0_3 = arith.constant 0 : index
    %c0_4 = arith.constant 0 : index
    %4 = vector.load %arg4[%c0_3, %c0_4] : memref<2x256xf32, #tpu.memory_space<vmem>>, vector<2x256xf32>
    tpu.vector_store %arg4[%c0_3, %c0_4], %3 {strides = array<i32>} : memref<2x256xf32, #tpu.memory_space<vmem>>, vector<2x256xf32>,
    return
  }
  func.func @transform_0(%arg0: i32, %arg1: i32) -> (i32, i32) {
    %c0_i32 = arith.constant 0 : i32
    return %arg0, %arg1 : i32, i32
  }
  func.func @transform_1(%arg0: i32, %arg1: i32) -> (i32, i32) {
    %c0_i32 = arith.constant 0 : i32
    %c0_i32_0 = arith.constant 0 : i32
    return %c0_i32, %arg1 : i32, i32
  }
  func.func @transform_2(%arg0: i32, %arg1: i32) -> (i32, i32) {
    %c0_i32 = arith.constant 0 : i32
    return %arg0, %arg1 : i32, i32
  }
}

</mosaic_0001>

<bundles_post_ra>
// kernel: tpu_custom_call.1
= control target key start
LH: loop header
LB: loop body
LE: loop exit
PB: predicated region body
PF: predicated region fallthrough
CT: control target
= control target key end

     0   :  { %7 = vsyncpa [#allocation3], 0  ;;  %s157_s0 = inlined_call_operand.hbm [shape: f32[2,256], index: 0, kind: input, shape index: {}, may-alias: {0,2}]   ;;  %s158_s1 = inlined_call_operand.vmem [shape: f32[1,256], index: 1, kind: input, shape index: {}]   ;;  %s159_s2 = inlined_call_operand.hbm [shape: f32[2,256], index: 2, kind: output, shape index: {}, may-alias: {0,2}]  }
   0x1   :  { %8 = vsyncpa [#allocation4], 0  ;;  %s112_s9 = smov [#allocation2]   ;;  %s64_s13 = scalar_lea.hbm %s157_s0, 64 }
   0x2   :  { %s15_s10 = sshll.u32 %s112_s9, 4  ;;  %p65_p0 = scmp.ne.s32.totalorder %s157_s0, %s64_s13  ;;  %s16_s10 = int_to_ptr.vmem [resolvable:$true] %s15_s10 }
   0x3   :  { %p68_p1 = scmp.lt.u32.totalorder %s64_s13, %s157_s0 }
   0x5   :  { %p70_p2 = pnand %p68_p1, %p65_p0 }
   0x7   :  { %73 = shalt.err (!%p70_p2)
}
   0x8   :  { %s74_s18 = scalar_lea.vmem %s16_s10, 64  ;;  %p79_p4 = scmp.lt.s32.totalorder %s16_s10, %s16_s10 }
   0x9   :  { %p75_p3 = scmp.ne.s32.totalorder %s16_s10, %s74_s18  ;;  %p80_p5 = scmp.lt.s32.totalorder %s74_s18, %s74_s18 }
   0xb   :  { %p81_p6 = por %p80_p5, %p79_p4 }
   0xd   :  { %p82_p7 = pnand %p81_p6, %p75_p3 }
   0xf   :  { %85 = shalt.err (!%p82_p7)
}
  0x10   :  { %18 = dma.hbm_to_vmem [thread:$0]  %s157_s0, 64, %s16_s10, [#allocation3]  }
  0x11   :  { %108 = dma.done.wait [#allocation3], 64  }
  0x12   :  { %109 = vsyncadd [#allocation3], 4294967232  ;;  %v27_v0 = vlaneseq  ;;  %v113_v1 = vmov 1983009808   ;;  %v25_v7 = vld [vmem:[%s158_s1] sm:$0x3] }
  0x13   :  { %v37_v2 = vunpack.c.l.s4 %v113_v1  ;;  %v24_v12 = vld [vmem:[#allocation2] sm:$0xf]  ;;  %s114_s23 = smov [#allocation5]  }
  0x14   :  { %v28_v3 = vshrl.u32 %v27_v0, 7  ;;  %s52_s0 = sshll.u32 %s114_s23, 4  ;;  %s53_s0 = int_to_ptr.vmem [resolvable:$true] %s52_s0 }
  0x15   :  { %v38_v6 = vunpack.c.0.s8 %v37_v2  ;;  %s86_s24 = scalar_lea.vmem %s53_s0, 64  ;;  %p91_p9 = scmp.lt.s32.totalorder %s53_s0, %s53_s0 }
  0x16   :  { %v29_v4 = vsub.s32 0, %v28_v3  ;;  %v33_v5 = vsub.s32 1, %v28_v3  ;;  %p87_p8 = scmp.ne.s32.totalorder %s53_s0, %s86_s24  ;;  %p92_p10 = scmp.lt.s32.totalorder %s86_s24, %s86_s24 }
  0x17   :  { %v41_v10 = vsub.s32 %v38_v6, %v28_v3 }
  0x18   :  { %v30_v8 = vrot.slane %v25_v7, %v29_v4  ;;  %v34_v9 = vrot.slane %v25_v7, %v33_v5  ;;  %p93_p11 = por %p92_p10, %p91_p9 }
  0x1a   :  { %v35_v11 = vcombine.low %v30_v8, %v34_v9  ;;  %p94_p12 = pnand %p93_p11, %p87_p8 }
  0x1c   :  { %v42_v13 = vrot.slane %v35_v11, %v41_v10 }
  0x1e   :  { %v44_v14 = vadd.f32 %v42_v13, %v24_v12 }
  0x20   :  { %45 = vst [vmem:[#allocation5] sm:$0xf] %v44_v14 }
  0x21   :  { %97 = shalt.err (!%p94_p12)
}
  0x22   :  { %s98_s26 = scalar_lea.hbm %s159_s2, 64 }
  0x23   :  { %p99_p13 = scmp.ne.s32.totalorder %s159_s2, %s98_s26  ;;  %p102_p0 = scmp.lt.u32.totalorder %s98_s26, %s159_s2 }
  0x25   :  { %p104_p1 = pnand %p102_p0, %p99_p13 }
  0x27   :  { %107 = shalt.err (!%p104_p1)
}
  0x28   :  { %55 = dma.vmem_to_hbm [thread:$0]  %s53_s0, 64, %s159_s2, [#allocation4]  }
  0x29   :  { %110 = dma.done.wait [#allocation4], 64  }
  0x2a   :  { %111 = vsyncadd [#allocation4], 4294967232 }
  0x2b   :  { %59 = vsyncpa [#allocation3], 1 }
  0x2c   :  { %60 = vsyncpa [#allocation4], 1 }

</bundles_post_ra>
